<compile_context>
chip_gen: v7x
topology: tpu7x:2x2x1
jax: 0.10.0
libtpu: 0.0.40
codegen_flags: <defaults>
</compile_context>

<pallas_src>
import functools

import jax
import jax.numpy as jnp
from jax import lax
from jax.experimental import pallas as pl
from jax.experimental.pallas import tpu as pltpu


# ----------------------------------------------------------------------------
# Host-side tokenizer logic (deterministic, synthetic token ids — no files).
# ----------------------------------------------------------------------------

TOKEN_IDS = {
    "<s>": 1,
    "▁<": 523,
    "<": 29966,
    "|": 29989,
    "embed": 17987,
    ">": 29958,
    "<0x0A>": 13,
    "user": 1792,
}


def _tokens_to_ids(tokens):
    return [TOKEN_IDS[t] for t in tokens]


USER_PATTERN_IDS = _tokens_to_ids(["▁<", "|", "user", "|", ">", "<0x0A>"])
EMBED_NEWLINE_PATTERN_IDS = _tokens_to_ids(
    ["<0x0A>", "<", "|", "embed", "|", ">", "<0x0A>"]
)
EMBED_PATTERN_IDS = _tokens_to_ids(["▁<", "|", "embed", "|", ">", "<0x0A>"])


def _find_array(arr, target, start_idx):
    if start_idx < 0:
        raise ValueError("start_idx must be non-negative")
    if not target or not arr:
        raise ValueError("Empty arr or target not allowed")
    target_len = len(target)
    for i in range(start_idx, len(arr) - target_len + 1):
        if list(arr[i:i + target_len]) == list(target):
            return i
    return -1


def _get_instruction_len(prompt_token_ids):
    instruction_len = 0
    if prompt_token_ids[0] != TOKEN_IDS["<s>"]:
        return instruction_len
    embed_pattern_ids = EMBED_PATTERN_IDS
    if _find_array(prompt_token_ids, USER_PATTERN_IDS, start_idx=1) == 1:
        embed_pattern_ids = EMBED_NEWLINE_PATTERN_IDS
    found = _find_array(prompt_token_ids, embed_pattern_ids, start_idx=1)
    if found != -1:
        instruction_len = found + len(embed_pattern_ids)
    else:
        instruction_len = 1
    return instruction_len


# ----------------------------------------------------------------------------
# Pallas kernel: masked per-sequence mean pooling, tiled over (H-block, T).
# ----------------------------------------------------------------------------

def _gritlm_pool_kernel(h_ref, start_ref, end_ref, invcnt_ref, o_ref, *, total_t):
    # h_ref:      [tT, tH]  hidden-state tile (input dtype, no up-cast)
    # start_ref:  [B, 1]    int32, first non-instruction token index per seq
    # end_ref:    [B, 1]    int32, one-past-last token index per seq
    # invcnt_ref: [B, 1]    float32, 1 / max(#non-instruction tokens, 1)
    # o_ref:      [B, tH]   float32 mean embeddings (accumulated in place;
    #                       resident across the t axis, written back per h)
    t = pl.program_id(1)
    nt = pl.num_programs(1)
    tT = h_ref.shape[0]
    B = o_ref.shape[0]

    @pl.when(t == 0)
    def _():
        o_ref[...] = jnp.zeros_like(o_ref)

    h = h_ref[...]
    if total_t % tT != 0:
        # Ragged last tile: the unfetched tail of the block is stale VMEM and
        # may hold NaN/Inf; 0 * NaN = NaN through the MXU, so zero those rows
        # explicitly.  This branch is emitted only when T % tT != 0.
        row = lax.broadcasted_iota(jnp.int32, (tT, 1), 0) + t * tT
        h = jnp.where(row < total_t, h, jnp.zeros_like(h))

    # Global token index for each row of this tile, per sequence: [B, tT].
    tok = lax.broadcasted_iota(jnp.int32, (B, tT), 1) + t * tT
    mask = jnp.logical_and(tok >= start_ref[...], tok < end_ref[...])
    # Selection matrix in the hidden-state dtype (0/1 exact in bf16/f32);
    # the MXU accumulates in f32 via preferred_element_type.
    sel = mask.astype(h.dtype)

    o_ref[...] += jnp.dot(sel, h, preferred_element_type=jnp.float32)

    @pl.when(t == nt - 1)
    def _():
        # Mean: multiply by precomputed reciprocal count (no VPU divide).
        o_ref[...] = o_ref[...] * invcnt_ref[...]


def _round_up(x, m):
    return ((x + m - 1) // m) * m


def _choose_tiles(T, H, itemsize, tile_t):
    # H tiling: split into two lane-aligned halves when possible so the
    # leading "parallel" grid axis can shard across v7x's two TensorCores.
    # Harmless (a couple extra grid steps) on single-core v5e/v6e.
    if H % 256 == 0:
        tile_h = H // 2
    else:
        tile_h = H

    # Budget the double-buffered [tT, tH] input tile to ~24 MiB so the kernel
    # stays comfortably inside v7x's 64 MiB physical VMEM (32 MiB scoped
    # default) while still amortizing the ~0.35 us per-grid-step overhead.
    budget_bytes = 24 * 1024 * 1024
    cap_rows = max(8, budget_bytes // (2 * tile_h * itemsize))
    tT = min(int(tile_t), int(cap_rows))
    tT = min(tT, _round_up(T, 8))
    if tT >= 128:
        tT = (tT // 128) * 128   # MXU / bf16-pack friendly granularity
    else:
        tT = max(8, (tT // 8) * 8)
    return tT, tile_h


def gritlm_pool(hidden_states, mask_starts, mask_ends, counts, *, tile_t=1024):
    """hidden_states: [T, H] float32/bfloat16; mask_starts/mask_ends: [B] int32;
    counts: [B] (= prompt_len - instruction_len).  Returns [B, H] float32
    L2-normalized mean embeddings."""
    T, H = hidden_states.shape
    B = int(mask_starts.shape[0])
    itemsize = jnp.dtype(hidden_states.dtype).itemsize

    tT, tH = _choose_tiles(T, H, itemsize, tile_t)
    nt = pl.cdiv(T, tT)
    nh = H // tH

    starts_2d = mask_starts.astype(jnp.int32).reshape(B, 1)
    ends_2d = mask_ends.astype(jnp.int32).reshape(B, 1)
    # Guard against count == 0 (prompt entirely "instruction").
    inv_counts_2d = (
        1.0 / jnp.maximum(counts.astype(jnp.float32), 1.0)
    ).reshape(B, 1)

    # True (unpadded) traffic: stream [T, H] once, write [B, H] once.
    cost = pl.CostEstimate(
        flops=2 * B * T * H,
        transcendentals=0,
        bytes_accessed=T * H * itemsize + B * H * 4 + 3 * B * 4,
    )

    # Derived VMEM budget: double-buffered input tile + output block(s) +
    # small metadata blocks, plus slack for compiler scratch.
    in_bytes = 2 * tT * tH * itemsize
    out_bytes = 2 * _round_up(B, 8) * tH * 4
    meta_bytes = 3 * 2 * _round_up(B, 8) * 128 * 4
    vmem_limit = min(96 * 1024 * 1024,
                     max(16 * 1024 * 1024,
                         in_bytes + out_bytes + meta_bytes + (8 << 20)))

    # TODO(synk): if an xprof trace shows exposed DMA between grid steps
    # (short per-tile DMA on v7x), try pipeline_mode=pl.Buffered(3) on the
    # hidden-state BlockSpec (budget the extra buffer against vmem_limit).
    mean = pl.pallas_call(
        functools.partial(_gritlm_pool_kernel, total_t=T),
        out_shape=jax.ShapeDtypeStruct((B, H), jnp.float32),
        grid_spec=pltpu.PrefetchScalarGridSpec(
            num_scalar_prefetch=0,
            grid=(nh, nt),
            in_specs=[
                pl.BlockSpec((tT, tH), lambda h, t: (t, h)),
                pl.BlockSpec((B, 1), lambda h, t: (0, 0)),
                pl.BlockSpec((B, 1), lambda h, t: (0, 0)),
                pl.BlockSpec((B, 1), lambda h, t: (0, 0)),
            ],
            out_specs=pl.BlockSpec((B, tH), lambda h, t: (0, h)),
        ),
        compiler_params=pltpu.CompilerParams(
            dimension_semantics=("parallel", "arbitrary"),
            vmem_limit_bytes=int(vmem_limit),
        ),
        cost_estimate=cost,
    )(hidden_states, starts_2d, ends_2d, inv_counts_2d)

    # PoolerNormalize: x / max(||x||_2, 1e-12).  Needs the full H row, so it
    # lives outside the H-sharded kernel; a trivial [B, H] op in XLA.
    sq = jnp.sum(mean * mean, axis=-1, keepdims=True)
    return mean * lax.rsqrt(jnp.maximum(sq, 1e-24))


# ----------------------------------------------------------------------------
# Full GritLMPooler.forward equivalent (host glue + Pallas hot path).
# ----------------------------------------------------------------------------

def gritlm_pooler_forward(hidden_states, prompts_token_ids, *, tile_t=1024):
    """hidden_states: [T, H]; prompts_token_ids: list of python int lists
    (one per sequence, concatenated along T in hidden_states)."""
    prompt_lens = [len(p) for p in prompts_token_ids]
    instruction_lens = [_get_instruction_len(p) for p in prompts_token_ids]

    starts, ends, counts = [], [], []
    start_idx = 0
    for plen, ilen in zip(prompt_lens, instruction_lens):
        end_idx = start_idx + plen
        starts.append(start_idx + ilen)   # first non-instruction token
        ends.append(end_idx)
        counts.append(plen - ilen)
        start_idx = end_idx

    return gritlm_pool(
        hidden_states,
        jnp.asarray(starts, dtype=jnp.int32),
        jnp.asarray(ends, dtype=jnp.int32),
        jnp.asarray(counts, dtype=jnp.float32),
        tile_t=tile_t,
    )


def _reference(hidden_states, prompts_token_ids):
    # Pure-JAX reference mirroring the PyTorch forward, for a sanity check.
    prompt_lens = [len(p) for p in prompts_token_ids]
    instruction_lens = [_get_instruction_len(p) for p in prompts_token_ids]
    outs = []
    start_idx = 0
    for plen, ilen in zip(prompt_lens, instruction_lens):
        end_idx = start_idx + plen
        seg = hidden_states[start_idx + ilen:end_idx].astype(jnp.float32)
        mean = jnp.sum(seg, axis=0) / float(max(plen - ilen, 1))
        norm = jnp.sqrt(jnp.sum(mean * mean))
        outs.append(mean / jnp.maximum(norm, 1e-12))
        start_idx = end_idx
    return jnp.stack(outs, axis=0)


if __name__ == "__main__":
    # Two synthetic prompts built from the deterministic token-id table.
    T_ = TOKEN_IDS
    FILL = 2000  # arbitrary "content" token id

    # seq0: <s> ▁< | embed | > <0x0A>  + 3 content tokens  -> instr_len = 7
    seq0 = [T_["<s>"], T_["▁<"], T_["|"], T_["embed"], T_["|"], T_[">"],
            T_["<0x0A>"], FILL, FILL + 1, FILL + 2]
    # seq1: <s> ▁< | user | > <0x0A>  <content> <0x0A> < | embed | > <0x0A>
    #       + 2 content tokens  -> user pattern => newline-embed pattern,
    #       instr_len = 15
    seq1 = [T_["<s>"], T_["▁<"], T_["|"], T_["user"], T_["|"], T_[">"],
            T_["<0x0A>"], FILL + 3, T_["<0x0A>"], T_["<"], T_["|"],
            T_["embed"], T_["|"], T_[">"], T_["<0x0A>"], FILL + 4, FILL + 5]

    prompts = [seq0, seq1]
    total_tokens = sum(len(p) for p in prompts)   # 27 (ragged vs the tile)
    hidden = 256  # multiple of 256 -> exercises the two-H-block parallel path

    key = jax.random.PRNGKey(0)
    hidden_states = jax.random.normal(key, (total_tokens, hidden),
                                      dtype=jnp.float32)

    # Small tile (8 rows) so the example exercises multi-tile accumulation
    # (4 t-steps) and the ragged last tile (27 % 8 = 3 valid rows).
    out = gritlm_pooler_forward(hidden_states, prompts, tile_t=8)
    out = jax.block_until_ready(out)

    ref = _reference(hidden_states, prompts)
    assert out.shape == (len(prompts), hidden)
    assert jnp.allclose(out, ref, atol=1e-5, rtol=1e-5), "mismatch vs reference"

    print("KERNEL_OK")
</pallas_src>

<mosaic_0001>
module attributes {stable_mosaic.version = 11 : i64} {
  func.func @_gritlm_pool_kernel(%arg0: i32, %arg1: i32, %arg2: memref<8x128xf32, #tpu.memory_space<vmem>>, %arg3: memref<2x1xi32, #tpu.memory_space<vmem>>, %arg4: memref<2x1xi32, #tpu.memory_space<vmem>>, %arg5: memref<2x1xf32, #tpu.memory_space<vmem>>, %arg6: memref<2x128xf32, #tpu.memory_space<vmem>>) attributes {dimension_semantics = [#tpu.dimension_semantics<parallel>, #tpu.dimension_semantics<arbitrary>], iteration_bounds = array<i64: 2, 4>, scalar_prefetch = 0 : i64, scratch_operands = 0 : i64, tpu.core_type = #tpu.core_type<tc>, window_params = [{transform_indices = @transform_0, window_bounds = array<i64: 8, 128>}, {pipeline_mode = #tpu.pipeline_mode<synchronous>, transform_indices = @transform_1, window_bounds = array<i64: 2, 1>}, {pipeline_mode = #tpu.pipeline_mode<synchronous>, transform_indices = @transform_2, window_bounds = array<i64: 2, 1>}, {pipeline_mode = #tpu.pipeline_mode<synchronous>, transform_indices = @transform_3, window_bounds = array<i64: 2, 1>}, {transform_indices = @transform_4, window_bounds = array<i64: 2, 128>}]} {
    %c0_i32 = arith.constant 0 : i32
    %0 = arith.cmpi eq, %arg1, %c0_i32 : i32
    %1 = arith.extui %0 : i1 to i32
    %c0_i32_0 = arith.constant 0 : i32
    %2 = arith.cmpi ne, %1, %c0_i32_0 : i32
    scf.if %2 {
      %cst_13 = arith.constant 0.000000e+00 : f32
      %34 = vector.broadcast %cst_13 : f32 to vector<2x128xf32>
      %c0_14 = arith.constant 0 : index
      %c0_15 = arith.constant 0 : index
      %35 = vector.load %arg6[%c0_14, %c0_15] : memref<2x128xf32, #tpu.memory_space<vmem>>, vector<2x128xf32>
      tpu.vector_store %arg6[%c0_14, %c0_15], %34 {strides = array<i32>} : memref<2x128xf32, #tpu.memory_space<vmem>>, vector<2x128xf32>,
    } else {
    }
    %c0 = arith.constant 0 : index
    %c0_1 = arith.constant 0 : index
    %3 = vector.load %arg2[%c0, %c0_1] : memref<8x128xf32, #tpu.memory_space<vmem>>, vector<8x128xf32>
    %4 = tpu.iota {dimensions = array<i32: 0>} : vector<8x1xi32>
    %c8_i32 = arith.constant 8 : i32
    %5 = arith.muli %arg1, %c8_i32 : i32
    %6 = vector.broadcast %5 : i32 to vector<8x1xi32>
    %7 = arith.addi %4, %6 : vector<8x1xi32>
    %c27_i32 = arith.constant 27 : i32
    %8 = vector.broadcast %c27_i32 : i32 to vector<8x1xi32>
    %9 = arith.cmpi slt, %7, %8 : vector<8x1xi32>
    %cst = arith.constant 0.000000e+00 : f32
    %10 = vector.broadcast %cst : f32 to vector<8x128xf32>
    %11 = vector.shape_cast %9 : vector<8x1xi1> to vector<8x1xi1>
    %12 = vector.broadcast %11 : vector<8x1xi1> to vector<8x128xi1>
    %13 = arith.select %12, %3, %10 : vector<8x128xi1>, vector<8x128xf32>
    %14 = tpu.iota {dimensions = array<i32: 1>} : vector<2x8xi32>
    %c8_i32_2 = arith.constant 8 : i32
    %15 = arith.muli %arg1, %c8_i32_2 : i32
    %16 = vector.broadcast %15 : i32 to vector<2x8xi32>
    %17 = arith.addi %14, %16 : vector<2x8xi32>
    %c0_3 = arith.constant 0 : index
    %c0_4 = arith.constant 0 : index
    %18 = vector.load %arg3[%c0_3, %c0_4] : memref<2x1xi32, #tpu.memory_space<vmem>>, vector<2x1xi32>
    %19 = vector.broadcast %18 : vector<2x1xi32> to vector<2x8xi32>
    %20 = arith.cmpi sge, %17, %19 : vector<2x8xi32>
    %c0_5 = arith.constant 0 : index
    %c0_6 = arith.constant 0 : index
    %21 = vector.load %arg4[%c0_5, %c0_6] : memref<2x1xi32, #tpu.memory_space<vmem>>, vector<2x1xi32>
    %22 = vector.broadcast %21 : vector<2x1xi32> to vector<2x8xi32>
    %23 = arith.cmpi slt, %17, %22 : vector<2x8xi32>
    %24 = arith.andi %20, %23 : vector<2x8xi1>
    %25 = arith.extui %24 : vector<2x8xi1> to vector<2x8xi32>
    %26 = arith.sitofp %25 : vector<2x8xi32> to vector<2x8xf32>
    %c0_7 = arith.constant 0 : index
    %c0_8 = arith.constant 0 : index
    %27 = vector.load %arg6[%c0_7, %c0_8] : memref<2x128xf32, #tpu.memory_space<vmem>>, vector<2x128xf32>
    %cst_9 = arith.constant dense<0.000000e+00> : vector<2x128xf32>
    %28 = tpu.matmul %26, %13, %cst_9 {dimension_numbers = #tpu.dot_dimension_numbers<[1], [0], [0], [1], [0, 0, 1, 1], [], []>} : vector<2x8xf32>, vector<8x128xf32>, vector<2x128xf32> -> vector<2x128xf32>
    %29 = arith.addf %27, %28 : vector<2x128xf32>
    %c0_10 = arith.constant 0 : index
    %c0_11 = arith.constant 0 : index
    %30 = vector.load %arg6[%c0_10, %c0_11] : memref<2x128xf32, #tpu.memory_space<vmem>>, vector<2x128xf32>
    tpu.vector_store %arg6[%c0_10, %c0_11], %29 {strides = array<i32>} : memref<2x128xf32, #tpu.memory_space<vmem>>, vector<2x128xf32>,
    %c3_i32 = arith.constant 3 : i32
    %31 = arith.cmpi eq, %arg1, %c3_i32 : i32
    %32 = arith.extui %31 : i1 to i32
    %c0_i32_12 = arith.constant 0 : i32
    %33 = arith.cmpi ne, %32, %c0_i32_12 : i32
    scf.if %33 {
      %c0_13 = arith.constant 0 : index
      %c0_14 = arith.constant 0 : index
      %34 = vector.load %arg6[%c0_13, %c0_14] : memref<2x128xf32, #tpu.memory_space<vmem>>, vector<2x128xf32>
      %c0_15 = arith.constant 0 : index
      %c0_16 = arith.constant 0 : index
      %35 = vector.load %arg5[%c0_15, %c0_16] : memref<2x1xf32, #tpu.memory_space<vmem>>, vector<2x1xf32>
      %36 = vector.broadcast %35 : vector<2x1xf32> to vector<2x128xf32>
      %37 = arith.mulf %34, %36 : vector<2x128xf32>
      %c0_17 = arith.constant 0 : index
      %c0_18 = arith.constant 0 : index
      %38 = vector.load %arg6[%c0_17, %c0_18] : memref<2x128xf32, #tpu.memory_space<vmem>>, vector<2x128xf32>
      tpu.vector_store %arg6[%c0_17, %c0_18], %37 {strides = array<i32>} : memref<2x128xf32, #tpu.memory_space<vmem>>, vector<2x128xf32>,
    } else {
    }
    return
  }
  func.func @transform_0(%arg0: i32, %arg1: i32) -> (i32, i32) {
    %c0_i32 = arith.constant 0 : i32
    return %arg1, %arg0 : i32, i32
  }
  func.func @transform_1(%arg0: i32, %arg1: i32) -> (i32, i32) {
    %c0_i32 = arith.constant 0 : i32
    %c0_i32_0 = arith.constant 0 : i32
    %c0_i32_1 = arith.constant 0 : i32
    return %c0_i32, %c0_i32_0 : i32, i32
  }
  func.func @transform_2(%arg0: i32, %arg1: i32) -> (i32, i32) {
    %c0_i32 = arith.constant 0 : i32
    %c0_i32_0 = arith.constant 0 : i32
    %c0_i32_1 = arith.constant 0 : i32
    return %c0_i32, %c0_i32_0 : i32, i32
  }
  func.func @transform_3(%arg0: i32, %arg1: i32) -> (i32, i32) {
    %c0_i32 = arith.constant 0 : i32
    %c0_i32_0 = arith.constant 0 : i32
    %c0_i32_1 = arith.constant 0 : i32
    return %c0_i32, %c0_i32_0 : i32, i32
  }
  func.func @transform_4(%arg0: i32, %arg1: i32) -> (i32, i32) {
    %c0_i32 = arith.constant 0 : i32
    %c0_i32_0 = arith.constant 0 : i32
    return %c0_i32, %arg0 : i32, i32
  }
}

</mosaic_0001>

<bundles_post_ra>
// kernel: tpu_custom_call.1
= control target key start
LH: loop header
LB: loop body
LE: loop exit
PB: predicated region body
PF: predicated region fallthrough
CT: control target
= control target key end

     0   :  { %9 = vsyncpa [#allocation3], 0  ;;  %s1005_s0 = inlined_call_operand.hbm [shape: f32[27,256], index: 0, kind: input, shape index: {}]   ;;  %s1006_s1 = inlined_call_operand.vmem [shape: s32[2,1], index: 1, kind: input, shape index: {}]   ;;  %s1007_s2 = inlined_call_operand.vmem [shape: s32[2,1], index: 2, kind: input, shape index: {}]   ;;  %s1008_s3 = inlined_call_operand.vmem [shape: f32[2,1], index: 3, kind: input, shape index: {}]   ;;  %s1009_s4 = inlined_call_operand.hbm [shape: f32[2,256], index: 4, kind: output, shape index: {}]  }
   0x1   :  { %11 = vsyncpa [#allocation3 + $0x1], 0 }
   0x2   :  { %12 = vsyncpa [#allocation4], 0 }
   0x3   :  { %14 = vsyncpa [#allocation4 + $0x1], 0  ;;  %s769_s15 = smov 0   ;;  %s771_s16 = smov 0  }
   0x4   :  { %s773_s17 = smov 0   ;;  %s775_s18 = smov 0  }
   0x5   :  { %s777_s19 = smov 0   ;;  %s779_s20 = smov 0  }
   0x6   :  { %s781_s21 = smov 0   ;;  %s783_s22 = smov 0  }
   0x7   :  { %s785_s23 = smov 0   ;;  %s787_s24 = smov 0  }
   0x8   :  { %s789_s25 = smov 0  }
   0x9 LB: > { %s447_s26 = sadd.s32 4294967295, %s735_s25   ;;  %s448_s27 = sadd.s32 4294967294, %s735_s25   ;;  %s735_s25 = sphi %s789_s25, %s20_s25   ;;  %s731_s24 = sphi %s787_s24, %s1037_s24   ;;  %s727_s23 = sphi %s785_s23, %s1036_s23   ;;  %s723_s22 = sphi %s783_s22, %s1035_s22   ;;  %s719_s21 = sphi %s781_s21, %s1034_s21   ;;  %s715_s20 = sphi %s779_s20, %s1033_s20   ;;  %s711_s19 = sphi %s777_s19, %s1032_s19   ;;  %s707_s18 = sphi %s775_s18, %s1031_s18   ;;  %s703_s17 = sphi %s773_s17, %s1030_s17   ;;  %s699_s16 = sphi %s771_s16, %s1029_s16   ;;  %s695_s15 = sphi %s769_s15, %s1028_s15  }
   0xa   : > { %s29_s28 = sadd.s32 1, %s727_s23  ;;  %s32_s29 = sadd.s32 1, %s731_s24 }
   0xb   : > { %p30_p0 = scmp.ge.s32.totalorder %s29_s28, 4  ;;  %s41_s30 = sadd.s32 1, %s715_s20 }
   0xc   : > { %p48_p1 = scmp.ne.s32.totalorder %s715_s20, %s711_s19  ;;  %p49_p2 = scmp.eq.s32.totalorder %s735_s25, 0 }
   0xd   : > { %s1039_s28 = smov (%p30_p0, %s29_s28), 0  ;;  %s1041_s29 = smov (!%p30_p0, %s32_s29), %s731_s24 }
   0xe   : > { %1013 = sst [smem:[#allocation8_spill]] %s1039_s28  ;;  %s36_s5 = ssub.s32 %s727_s23, %s1039_s28 }
   0xf   : > { %p835_p3 = por %p49_p2, %p48_p1  ;;  %p34_p4 = scmp.ge.s32.totalorder %s1041_s29, 2 }
  0x10   : > { %p54_p5 = scmp.ne.s32.totalorder %s711_s19, %s707_s18  ;;  %p55_p6 = scmp.eq.s32.totalorder %s447_s26, 0 }
  0x11   : > { %s130_s7 = sadd.s32 1, %s703_s17  ;;  %s1043_s29 = smov (%p34_p4, %s1041_s29), 0 }
  0x12   : > { %1015 = sst [smem:[#allocation9_spill]] %s1043_s29  ;;  %p843_p7 = por %p55_p6, %p54_p5 }
  0x13   : > { %p140_p8 = scmp.ne.s32.totalorder %s703_s17, %s699_s16  ;;  %s37_s9 = ssub.s32 %s731_s24, %s1043_s29 }
  0x14   : > { %p141_p9 = scmp.eq.s32.totalorder %s447_s26, 7  ;;  %s38_s10 = sor.u32 %s37_s9, %s36_s5 }
  0x15   : > { %p128_p10 = scmp.eq.s32.totalorder %s37_s9, 0  ;;  %p39_p11 = scmp.eq.s32.totalorder %s38_s10, 0 }
  0x16   : > { %p851_p12 = por %p141_p9, %p140_p8  ;;  %p146_p13 = scmp.ne.s32.totalorder %s699_s16, %s695_s15 }
  0x17   : > { %s856_s12 = scalar_select %p128_p10, %s703_s17, %s130_s7  }
  0x18   : > { %s1017_s11 = scalar_select %p851_p12, 1, 0 }
  0x19   : > { %s859_s13 = scalar_select %p39_p11, %s715_s20, %s41_s30  }
  0x1a   : > { %p147_p0 = scmp.eq.s32.totalorder %s448_s27, 7  ;;  %p486_p1 = scmp.lt.s32.totalorder %s735_s25, 8 }
  0x1b   : > { %1018 = sst [smem:[#allocation10_spill]] %s859_s13  ;;  %s176_s18 = sand.u32 1, %s715_s20  }
  0x1c   : > { %p864_p2 = por %p147_p0, %p146_p13  ;;  %s451_s26 = sshll.u32 %s176_s18, 3 }
  0x1d   : > { %s452_s5 = sshll.u32 %s727_s23, 1  ;;  %s180_s10 = scalar_lea.vmem [#allocation2], %s451_s26 }
  0x1e   : > { %s1019_s14 = scalar_select %p864_p2, 1, 0 }
  0x1f   : > { %s185_s9 = sadd.s32 %s731_s24, %s452_s5  ;;  %s189_s29 = sshll.u32 %s180_s10, 4  ;;  %s871_s29 = int_to_ptr.vmem [resolvable:$true] %s189_s29 }
  0x20   : > { %s453_s28 = sshll.u32 %s185_s9, 7  ;;  %p880_p4 = pnand %p486_p1, %p835_p3 }
  0x21   : > { %s876_s13 = scalar_lea.hbm %s1005_s0, %s453_s28  ;;  %s177_s26 = scalar_lea.sflag [#allocation3], %s176_s18 }
  0x22   : > { %s583_s5 = scalar_lea.hbm %s876_s13, 128  ;;  %p585_p9 = pneg %p880_p4 }
  0x23   : > { %p584_p8 = scmp.ne.s32.totalorder %s876_s13, %s583_s5  ;;  %s588_s9 = scalar_lea.hbm %s1005_s0, 1024 }
  0x24   : > { %p589_p3 = scmp.lt.u32.totalorder %s876_s13, %s1005_s0  ;;  %p590_p13 = scmp.lt.u32.totalorder %s588_s9, %s583_s5 }
  0x25   : > { %p586_p10 = pnand %p585_p9, %p584_p8  ;;  %p592_p1 = scmp.lt.u32.totalorder %s583_s5, %s876_s13 }
  0x26   : > { %p591_p0 = por %p590_p13, %p589_p3 }
  0x27   : > { %p587_p11 = pneg %p586_p10 }
  0x28   : > { %p593_p5 = por %p592_p1, %p591_p0 }
  0x2a   : > { %p594_p6 = pnand %p593_p5, %p587_p11 }
  0x2c   : > { %597 = shalt.err (!%p594_p6)
}
  0x2d   : > { %s598_s18 = scalar_lea.vmem %s871_s29, 128  ;;  %s737_s30 = smov [#allocation2]  }
  0x2e   : > { %p599_p8 = scmp.ne.s32.totalorder %s871_s29, %s598_s18  ;;  %s603_s28 = sshll.u32 %s737_s30, 4  ;;  %s604_s28 = int_to_ptr.vmem [resolvable:$false] %s603_s28 }
  0x2f   : > { %s605_s6 = scalar_lea.vmem %s604_s28, 256  ;;  %p606_p12 = scmp.lt.s32.totalorder %s871_s29, %s604_s28 }
  0x30   : > { %p601_p10 = pnand %p599_p8, %p585_p9  ;;  %p607_p3 = scmp.lt.s32.totalorder %s605_s6, %s598_s18 }
  0x32   : > { %p602_p2 = pneg %p601_p10  ;;  %p608_p13 = por %p607_p3, %p606_p12 }
  0x34   : > { %p609_p0 = pnand %p608_p13, %p602_p2 }
  0x36   : > { %612 = shalt.err (!%p609_p0)
}
  0x37   : > { %481 = dma.hbm_to_vmem [thread:$0]  (!%p880_p4), %s876_s13, 128, %s871_s29, %s177_s26  }
  0x38   : > { %p1021_p5 = scmp.lt.s32.totalorder %s735_s25, 9  ;;  %p1022_p6 = scmp.ge.s32.totalorder %s735_s25, 1 }
  0x3a   : > { %p195_p9 = pnand %p1022_p6, %p1021_p5 }
  0x3b   : > { %s200_s5 = sand.u32 (!%p195_p9), 1, %s711_s19  }
  0x3c   : > { %198 = sbr.rel (%p195_p9) target bundleno = 464 (0x1d0), region = 36  ;;  %s455_s9 = sshll.u32 (!%p195_p9), %s200_s5, 3 }
  0x3d   : > { %s201_s10 = scalar_lea.sflag (!%p195_p9), [#allocation3], %s200_s5  ;;  %s204_s7 = scalar_lea.vmem (!%p195_p9), [#allocation2], %s455_s9 }
  0x43   : > { %686 = dma.done.wait (%p843_p7), %s201_s10, 128  }
  0x44   : > { %688 = vsyncadd (%p843_p7), %s201_s10, 4294967168  ;;  %s226_s27 = sand.u32 1, %s699_s16   ;;  %p457_p12 = scmp.ne.s32.totalorder %s719_s21, 0 }
  0x45   : > { %s456_s29 = sshll.u32 %s226_s27, 1  ;;  %v738_v0 = vmov (!%p457_p12), 0.0  }
  0x46   : > { %s923_s13 = scalar_lea.vmem [#allocation5], %s456_s29  ;;  %232 = sbr.rel (%p457_p12) target bundleno = 77 (0x4d), region = 44 }
  0x47   : > { %233 = vst [vmem:[%s923_s13] sm:$0x3] (!%p457_p12), %v738_v0 }
  0x4d PF: > { %v247_v1 = vld [vmem:[%s1006_s1] sm:$0x3]  ;;  %v235_v2 = vlaneseq  ;;  %s458_s8 = sshll.u32 %s719_s21, 3  ;;  %v739_v3 = vmov 0   ;;  %v740_v10 = vmov 0.0   ;;  %vm741_vm1 = vmmov 0  }
  0x4e   : > { %581 = vset.pattern.permute.xlu0 %v739_v3  ;;  %v238_v4 = vstv %s458_s8  ;;  %v252_v6 = vld [vmem:[%s1007_s2] sm:$0x3]  ;;  %469 = vmatprep.subr.mxu0 %v740_v10  ;;  %vm261_vm4 = vcmask 64512   ;;  %v260_v15 = vld [vmem:[%s923_s13] sm:$0x3]  ;;  %p462_p7 = scmp.ne.s32.totalorder %s719_s21, 3 }
  0x4f   : > { %249 = vperm.xlu0 %581, %v247_v1   ;;  %v245_v5 = vand.u32 127, %v235_v2  ;;  %v236_v7 = vshrl.u32 %v235_v2, 7  ;;  %v234_v11 = vld [vmem:[%s204_s7] sm:$0xff]  ;;  %471 = vmatprep.mubr.msk.f32.mxu0 %vm741_vm1, %v740_v10  ;;  %v742_v20 = vmov (!%p462_p7), 0  }
  0x50   : > { %v342_v19 = vld [vmem:[%s1008_s3] sm:$0x3] (!%p462_p7) }
  0x51   : > { %v246_v8 = vadd.s32 %v245_v5, %v238_v4  ;;  %v239_v9 = vadd.s32 %v238_v4, %v236_v7 }
  0x53   : > { %254 = vperm.xlu0 %581, %v252_v6   ;;  %vm240_vm0 = vcmp.lt.s32.totalorder %v239_v9, 27 }
  0x54   : > { %470 = vmatpush3.msk.msra.mxu0 %vm240_vm0, %v234_v11 }
  0x57   : > { %582 = vset.pattern.permute.xlu0 (!%p462_p7), %v742_v20 }
  0x58   : > { %345 = vperm.xlu0 (!%p462_p7), %582, %v342_v19  }
  0xce   : > { %v250_v12 = vpop.permute.xlu0 %249 }
  0xcf   : > { %vm251_vm2 = vcmp.ge.s32.totalorder %v246_v8, %v250_v12 }
  0xd2   : > { %v255_v13 = vpop.permute.xlu0 %254 }
  0xd3   : > { %vm256_vm3 = vcmp.lt.s32.totalorder %v246_v8, %v255_v13 }
  0xd4   : > { %vm257_vm5 = vmand %vm251_vm2, %vm256_vm3 }
  0xd5   : > { %v459_v14 = vsel %vm257_vm5, 1.0, %v740_v10 }
  0xd6   : > { %472 = vmatmul.mubr.msk.f32.vlgmr.msra.gmra.mrb[0].mxu0 %vm261_vm4, %v459_v14 }
  0xd7   : > { %v346_v22 = vpop.permute.xlu0 (!%p462_p7), %345 }
 0x1a6   : > { %340 = sbr.rel (%p462_p7) target bundleno = 439 (0x1b7), region = 48 }
 0x1a9   : > { %v331_v16 = vpop.f32.mrb[0].mxu0 }
 0x1aa   : > { %v335_v17 = vadd.f32 %v331_v16, %v260_v15  ;;  %v473_v18 = vpop.f32.mrb[1].mxu0 }
 0x1ac   : > { %336 = vst [vmem:[%s923_s13] sm:$0x3] %v335_v17 }
 0x1b3   : > { %v341_v21 = vld [vmem:[%s923_s13] sm:$0x3] }
 0x1b4   : > { %v348_v23 = vmul.f32 %v346_v22, %v341_v21 }
 0x1b6   : > { %349 = vst [vmem:[%s923_s13] sm:$0x3] %v348_v23 }
 0x1b7 PF: > { %s464_s21 = sshll.u32 %s723_s22, 5  ;;  %s364_s29 = sshll.u32 %s923_s13, 4  ;;  %s365_s29 = int_to_ptr.vmem [resolvable:$true] %s364_s29 }
 0x1b8   : > { %s946_s7 = scalar_lea.hbm %s1009_s4, %s464_s21  ;;  %s351_s26 = scalar_lea.sflag [#allocation4], %s226_s27 }
 0x1b9   : > { %s613_s18 = scalar_lea.vmem %s365_s29, 32  ;;  %p1023_p4 = scmp.ne.s32.totalorder %s1017_s11, 0 }
 0x1ba   : > { %p614_p2 = scmp.ne.s32.totalorder %s365_s29, %s613_s18  ;;  %s743_s8 = smov [#allocation5]  }
 0x1bb   : > { %s617_s30 = sshll.u32 %s743_s8, 4  ;;  %s618_s30 = int_to_ptr.vmem [resolvable:$false] %s617_s30 }
 0x1bc   : > { %p615_p11 = pnand %p614_p2, %p1023_p4  ;;  %s619_s28 = scalar_lea.vmem %s618_s30, 64 }
 0x1bd   : > { %p620_p8 = scmp.lt.s32.totalorder %s365_s29, %s618_s30  ;;  %p621_p10 = scmp.lt.s32.totalorder %s619_s28, %s613_s18 }
 0x1be   : > { %p616_p1 = pneg %p615_p11 }
 0x1bf   : > { %p622_p3 = por %p621_p10, %p620_p8 }
 0x1c1   : > { %p623_p13 = pnand %p622_p3, %p616_p1 }
 0x1c3   : > { %626 = shalt.err (!%p623_p13)
}
 0x1c4   : > { %s627_s22 = scalar_lea.hbm %s946_s7, 32  ;;  %s631_s6 = scalar_lea.hbm %s1009_s4, 64 }
 0x1c5   : > { %p628_p0 = scmp.ne.s32.totalorder %s946_s7, %s627_s22  ;;  %p632_p9 = scmp.lt.u32.totalorder %s946_s7, %s1009_s4 }
 0x1c6   : > { %p633_p12 = scmp.lt.u32.totalorder %s631_s6, %s627_s22  ;;  %p635_p2 = scmp.lt.u32.totalorder %s627_s22, %s946_s7 }
 0x1c7   : > { %p629_p5 = pnand %p628_p0, %p1023_p4 }
 0x1c8   : > { %p634_p7 = por %p633_p12, %p632_p9 }
 0x1c9   : > { %p630_p6 = pneg %p629_p5 }
 0x1ca   : > { %p636_p11 = por %p635_p2, %p634_p7 }
 0x1cc   : > { %p637_p1 = pnand %p636_p11, %p630_p6 }
 0x1ce   : > { %640 = shalt.err (!%p637_p1)
}
 0x1cf   : > { %476 = dma.vmem_to_hbm [thread:$0]  (%p1023_p4), %s365_s29, 32, %s946_s7, %s351_s26  }
 0x1d0 PF: > { %p487_p8 = scmp.ge.s32.totalorder %s735_s25, 2  ;;  %s376_s9 = sand.u32 1, %s695_s15  }
 0x1d1   : > { %p1024_p10 = scmp.ne.s32.totalorder %s1019_s14, 0  ;;  %s377_s10 = scalar_lea.sflag [#allocation4], %s376_s9 }
 0x1d3   : > { %p483_p3 = pnand %p487_p8, %p1024_p10 }
 0x1d5   : > { %690 = dma.done.wait (!%p483_p3), %s377_s10, 32  }
 0x1d6   : > { %692 = vsyncadd (!%p483_p3), %s377_s10, 4294967264  ;;  %s20_s25 = sadd.s32 1, %s735_s25   ;;  %s1025_s11 = sld [smem:[#allocation10_spill]] }
 0x1d7   : > { %p17_p13 = scmp.ge.s32.totalorder %s20_s25, 10   ;;  %s1026_s7 = sld [smem:[#allocation8_spill]] }
 0x1d8   : > { %s1027_s29 = sld [smem:[#allocation9_spill]]  ;;  %s1028_s15 = smov %s699_s16 }
 0x1d9   : > { %s1029_s16 = smov %s703_s17  ;;  %s1030_s17 = smov %s856_s12 }
 0x1da   : > { %s1031_s18 = smov %s711_s19  ;;  %s1032_s19 = smov %s715_s20 }
 0x1db   : > { %s1034_s21 = smov %s727_s23  ;;  %s1035_s22 = smov %s731_s24 }
 0x1dc   : > { %s1033_s20 = smov %s1025_s11  ;;  %19 = sbr.rel (!%p17_p13) target bundleno = 9 (0x9), region = 89 }
 0x1dd   : > { %s1036_s23 = smov %s1026_s7 }
 0x1de   : > { %s1037_s24 = smov %s1027_s29 }
 0x1e3   :  { %382 = vsyncpa [#allocation3], 1 }
 0x1e4   :  { %384 = vsyncpa [#allocation3 + $0x1], 1 }
 0x1e5   :  { %385 = vsyncpa [#allocation4], 1 }
 0x1e6   :  { %387 = vsyncpa [#allocation4 + $0x1], 1 }

</bundles_post_ra>
